<compile_context>
chip_gen: v7x
topology: tpu7x:2x2x1
jax: 0.10.0
libtpu: 0.0.40
codegen_flags: <defaults>
</compile_context>

<pallas_src>
import functools

import jax
import jax.numpy as jnp
from jax.experimental import pallas as pl
from jax.experimental.pallas import tpu as pltpu

_SUBLANE = 8
_LANE = 128
_VMEM_BUDGET = 40 * 2**20      # conservative: well inside v7x's 64 MiB VMEM


# --------------------------------------------------------------------------- #
# Kernels
# --------------------------------------------------------------------------- #
def _normalize_kernel(emb_ref, out_ref):
    """Row-wise L2 normalization: out = x * rsqrt(max(sum(x^2), eps^2))."""
    x = emb_ref[...].astype(jnp.float32)
    sq = jnp.sum(x * x, axis=1, keepdims=True)
    inv = jax.lax.rsqrt(jnp.maximum(sq, 1e-24))     # == 1 / max(||x||_2, 1e-12)
    out_ref[...] = (x * inv).astype(out_ref.dtype)


def _loss_tile_kernel(emb_i_ref, emb_jt_ref, label_ref, psum_ref, pcnt_ref, *,
                      pos_margin, neg_margin, n_valid, tm, tn,
                      mask_pad, int_label):
    i = pl.program_id(0)
    j = pl.program_id(1)

    # Per-i-row-block partials live directly in the output blocks (their index
    # map ignores j, so they stay VMEM-resident across the whole j sweep and
    # are written back when i changes).  Init at j == 0; no finalize needed.
    # This is what makes the i axis safely "parallel" on v7x megacore: each
    # core owns disjoint i blocks and disjoint output rows.
    @pl.when(j == 0)
    def _init():
        psum_ref[...] = jnp.zeros_like(psum_ref)
        pcnt_ref[...] = jnp.zeros_like(pcnt_ref)

    a = emb_i_ref[...]                      # (tm, D)  pre-normalized rows
    b = emb_jt_ref[...]                     # (D, tn)  pre-transposed columns

    # Cosine similarity on the MXU (bf16 inputs, f32 accumulation); RHS is
    # already (D, tn) so no per-tile XLU transpose is generated.
    sim = jnp.dot(a, b, preferred_element_type=jnp.float32)   # (tm, tn) f32
    dis = 1.0 - sim

    pos = jnp.maximum(dis - pos_margin, 0.0)
    neg = jnp.maximum(neg_margin - dis, 0.0)
    if int_label:
        # 0/1 labels: a single select instead of the weighted blend
        # (skips the int8->f32 convert and three f32 mul/adds per element).
        loss = 0.5 * jnp.where(label_ref[...] != 0, pos * pos, neg * neg)
    else:
        # Float-valued (weight) labels, transported as bf16, blended in f32.
        lab = label_ref[...].astype(jnp.float32)
        loss = 0.5 * (lab * pos * pos + (1.0 - lab) * neg * neg)

    if mask_pad:    # zero contributions from zero-padded rows/cols
        rows = i * tm + jax.lax.broadcasted_iota(jnp.int32, (tm, tn), 0)
        cols = j * tn + jax.lax.broadcasted_iota(jnp.int32, (tm, tn), 1)
        valid = (rows < n_valid) & (cols < n_valid)
        loss = jnp.where(valid, loss, 0.0)

    def _fold_rows(x):
        # (tm, tn) -> (8, tn): elementwise-add the tm/8 sublane groups.
        # Pure VPU work; no cross-lane XLU reduce on the per-tile path.
        if tm == _SUBLANE:
            return x
        return jnp.sum(x.reshape(tm // _SUBLANE, _SUBLANE, tn), axis=0)

    psum_ref[...] += _fold_rows(loss)
    pcnt_ref[...] += _fold_rows((loss > 0.0).astype(jnp.float32))
    # TODO(synk): symmetry (only j >= i tiles, doubled off-diagonal) and label
    # bit-packing would further cut HBM traffic but need preconditions /
    # interface changes not guaranteed by the module.


# --------------------------------------------------------------------------- #
# Tiling / VMEM policy
# --------------------------------------------------------------------------- #
def _round_up(x, m):
    return -(-x // m) * m


def _pick_tile(n: int) -> int:
    """Base tile for the pair matrix.  Bigger tiles amortize the ~0.35us/step
    pipeline overhead and run closer to the HBM roofline, so prefer padding to
    512/256 unless the padded-area waste outweighs the efficiency gain."""
    if n < _LANE:
        return _round_up(n, _SUBLANE)       # single-tile case
    weight = {512: 1.00, 256: 1.08, 128: 1.25}

    def cost(t):
        n_pad = _round_up(n, t)
        return n_pad * n_pad * weight[t]

    return min((512, 256, 128), key=cost)


def _vmem_bytes(tm, tn, d, elt, label_bytes):
    emb_i = 2 * tm * d * elt                # LHS row block, double-buffered
    emb_j = 2 * d * tn * elt                # transposed RHS block, double-buffered
    lab = 2 * tm * tn * label_bytes         # label tile, double-buffered
    outs = 2 * 2 * _SUBLANE * tn * 4        # two (8, tn) f32 partial blocks
    temps = 6 * tm * tn * 4                 # f32 epilogue temporaries
    return emb_i + emb_j + lab + outs + temps


def _choose_tiles(tile, n_pad, d, elt, label_bytes):
    """Prefer a full-width TN (RHS and a big, lane-dense label block streamed
    once per row block; the j grid collapses to 1).  Shrink TM (never the
    lane-wide TN) when VMEM is tight; fall back to square tiles for huge D."""
    tn_candidates = (n_pad, tile) if n_pad > tile else (tile,)
    for tn in tn_candidates:
        tm = tile
        while tm > 128 and _vmem_bytes(tm, tn, d, elt, label_bytes) > _VMEM_BUDGET:
            tm //= 2
        if _vmem_bytes(tm, tn, d, elt, label_bytes) <= _VMEM_BUDGET:
            return tm, tn
    return (128 if tile > 128 else tile), tile


# --------------------------------------------------------------------------- #
# Wrappers
# --------------------------------------------------------------------------- #
def _normalize_embedding(emb, out_dtype=jnp.bfloat16):
    """Pre-pass: L2-normalize rows once; emits a matmul-ready embedding."""
    n_pad, d = emb.shape
    row_tile = min(128, n_pad)              # n_pad is always a multiple of this
    return pl.pallas_call(
        _normalize_kernel,
        out_shape=jax.ShapeDtypeStruct((n_pad, d), out_dtype),
        grid=(n_pad // row_tile,),
        in_specs=[pl.BlockSpec((row_tile, d), lambda r: (r, 0))],
        out_specs=pl.BlockSpec((row_tile, d), lambda r: (r, 0)),
        compiler_params=pltpu.CompilerParams(
            dimension_semantics=("parallel",)),
    )(emb)


def _pairwise_partials(emb_n, emb_t, lab, *, tm, tn, n_valid, pos_margin,
                       neg_margin, int_label, vmem_limit):
    """Tiled pairwise loss -> per-row-block (8, tn) partial sums / counts."""
    n_pad, d = emb_n.shape
    gi, gj = n_pad // tm, n_pad // tn

    kernel = functools.partial(
        _loss_tile_kernel,
        pos_margin=float(pos_margin), neg_margin=float(neg_margin),
        n_valid=n_valid, tm=tm, tn=tn,
        mask_pad=(n_pad != n_valid), int_label=int_label)

    cp = dict(dimension_semantics=("parallel", "arbitrary"))
    if vmem_limit is not None:
        cp["vmem_limit_bytes"] = int(vmem_limit)

    psum, pcnt = pl.pallas_call(
        kernel,
        out_shape=(jax.ShapeDtypeStruct((_SUBLANE * gi, tn), jnp.float32),
                   jax.ShapeDtypeStruct((_SUBLANE * gi, tn), jnp.float32)),
        grid=(gi, gj),
        in_specs=[
            pl.BlockSpec((tm, d), lambda i, j: (i, 0)),     # LHS row block
            pl.BlockSpec((d, tn), lambda i, j: (0, j)),     # transposed RHS block
            pl.BlockSpec((tm, tn), lambda i, j: (i, j)),    # label tile
        ],
        out_specs=(pl.BlockSpec((_SUBLANE, tn), lambda i, j: (i, 0)),
                   pl.BlockSpec((_SUBLANE, tn), lambda i, j: (i, 0))),
        compiler_params=pltpu.CompilerParams(**cp),
    )(emb_n, emb_t, lab)
    return jnp.sum(psum), jnp.sum(pcnt)


def contrastive_loss(embedding: jax.Array, label: jax.Array,
                     pos_margin: float = 0.0, neg_margin: float = 1.0,
                     reduction: str = 'AvgNonZero',
                     matmul_dtype=jnp.bfloat16) -> jax.Array:
    """Pallas implementation of ContrastiveLoss.forward (CosineSimilarity)."""
    if reduction not in ('AvgNonZero', 'mean', 'sum'):
        # TODO(synk): reduction='none' / return_distance=True would require the
        # full (N, N) matrix as a kernel output; only scalar reductions here.
        raise ValueError(f'Unsupported reduction: {reduction}')

    n, d = embedding.shape
    assert label.shape == (n, n), "label must be the (N, N) pairwise label matrix"

    # 0/1 labels travel as int8 (4x less HBM traffic than f32); float-valued
    # weight labels travel as bf16 (2x less; cast to f32 in the epilogue).
    int_label = not jnp.issubdtype(label.dtype, jnp.floating)
    lab = label.astype(jnp.int8 if int_label else jnp.bfloat16)

    tile = _pick_tile(n)
    n_pad = _round_up(n, tile)
    emb = embedding
    if n_pad != n:
        emb = jnp.pad(emb, ((0, n_pad - n), (0, 0)))
        lab = jnp.pad(lab, ((0, n_pad - n), (0, n_pad - n)))

    elt = jnp.dtype(matmul_dtype).itemsize
    label_bytes = jnp.dtype(lab.dtype).itemsize
    tm, tn = _choose_tiles(tile, n_pad, d, elt, label_bytes)
    est = _vmem_bytes(tm, tn, d, elt, label_bytes)
    vmem_limit = min(1.4 * est, 56 * 2**20) if est > 24 * 2**20 else None

    emb_n = _normalize_embedding(emb, matmul_dtype)     # (N_pad, D), one pass
    emb_t = emb_n.T                                     # (D, N_pad) MXU-ready RHS

    total, cnt = _pairwise_partials(
        emb_n, emb_t, lab, tm=tm, tn=tn, n_valid=n,
        pos_margin=pos_margin, neg_margin=neg_margin,
        int_label=int_label, vmem_limit=vmem_limit)

    if reduction == 'sum':
        return total
    mean = total * (1.0 / float(n * n))
    if reduction == 'mean':
        return mean
    # AvgNonZero: sum / count(loss > 0), falling back to mean if all-zero.
    return jnp.where(cnt > 0.0, total / jnp.maximum(cnt, 1.0), mean)


# --------------------------------------------------------------------------- #
# Pure-JAX reference + demo
# --------------------------------------------------------------------------- #
def _reference_loss(embedding, label, pos_margin=0.0, neg_margin=1.0,
                    reduction='AvgNonZero', matmul_dtype=jnp.bfloat16):
    """Mirror of the PyTorch forward, using the same normalize/matmul dtypes
    as the kernel so the comparison is apples-to-apples."""
    x = embedding.astype(jnp.float32)
    inv = jax.lax.rsqrt(jnp.maximum(jnp.sum(x * x, axis=1, keepdims=True), 1e-24))
    emb_n = (x * inv).astype(matmul_dtype)
    sim = jax.lax.dot_general(emb_n, emb_n, (((1,), (1,)), ((), ())),
                              preferred_element_type=jnp.float32)
    dis = 1.0 - sim
    lab = label.astype(jnp.float32)
    loss = 0.5 * (lab * jnp.maximum(dis - pos_margin, 0.0) ** 2 +
                  (1.0 - lab) * jnp.maximum(neg_margin - dis, 0.0) ** 2)
    if reduction == 'sum':
        return jnp.sum(loss)
    if reduction == 'mean':
        return jnp.mean(loss)
    nz = jnp.sum(loss > 0)
    return jnp.where(nz > 0, jnp.sum(loss) / nz, jnp.mean(loss))


if __name__ == "__main__":
    key = jax.random.PRNGKey(0)
    k1, k2, k3, k4, k5 = jax.random.split(key, 5)

    # --- Test 1: small shapes implied by the module (batch N=8, hidden D=32),
    # binary labels, default AvgNonZero reduction. ----------------------------
    # The label diagonal is zeroed so no pair sits exactly on the loss==0
    # knife edge (positive self-pairs with pos_margin=0 have dis ~ 0, whose
    # strict `loss > 0` count is sensitive to bf16 rounding; fine for the
    # kernel, but it would make the test comparison nondeterministic).
    N, D = 8, 32
    emb1 = jax.random.normal(k1, (N, D), dtype=jnp.float32)
    lab1 = jax.random.bernoulli(k2, 0.4, (N, N)).astype(jnp.int8)
    lab1 = lab1 * (1 - jnp.eye(N, dtype=jnp.int8))

    loss1 = contrastive_loss(emb1, lab1)
    jax.block_until_ready(loss1)
    ref1 = _reference_loss(emb1, lab1)
    assert jnp.allclose(loss1, ref1, rtol=1e-3, atol=1e-6), (loss1, ref1)

    # --- Test 2: non-tile-aligned N (exercises padding/masking, multi-block
    # "parallel" i grid and the full-width TN / transposed-RHS path). ---------
    N2, D2 = 300, 64
    emb2 = jax.random.normal(k3, (N2, D2), dtype=jnp.float32)
    lab2 = jax.random.bernoulli(k4, 0.05, (N2, N2)).astype(jnp.int8)
    lab2 = lab2 * (1 - jnp.eye(N2, dtype=jnp.int8))

    loss2 = contrastive_loss(emb2, lab2)
    jax.block_until_ready(loss2)
    ref2 = _reference_loss(emb2, lab2)
    assert jnp.allclose(loss2, ref2, rtol=2e-3, atol=1e-5), (loss2, ref2)

    # --- Test 3: float-valued (weight) labels via the bf16 label path,
    # non-default margins, 'sum' reduction. -----------------------------------
    wlab = jax.random.uniform(k5, (N, N)).astype(jnp.bfloat16).astype(jnp.float32)
    loss3 = contrastive_loss(emb1, wlab, pos_margin=0.1, neg_margin=0.9,
                             reduction='sum')
    jax.block_until_ready(loss3)
    ref3 = _reference_loss(emb1, wlab, pos_margin=0.1, neg_margin=0.9,
                           reduction='sum')
    assert jnp.allclose(loss3, ref3, rtol=1e-3, atol=1e-5), (loss3, ref3)

    print("KERNEL_OK")
</pallas_src>

<mosaic_0001>
module attributes {stable_mosaic.version = 11 : i64} {
  func.func @_normalize_kernel(%arg0: i32, %arg1: memref<8x32xf32, #tpu.memory_space<vmem>>, %arg2: memref<8x32xbf16, #tpu.memory_space<vmem>>) attributes {dimension_semantics = [#tpu.dimension_semantics<parallel>], iteration_bounds = array<i64: 1>, scalar_prefetch = 0 : i64, scratch_operands = 0 : i64, tpu.core_type = #tpu.core_type<tc>, window_params = [{transform_indices = @transform_0, window_bounds = array<i64: 8, 32>}, {transform_indices = @transform_1, window_bounds = array<i64: 8, 32>}]} {
    %c0 = arith.constant 0 : index
    %c0_0 = arith.constant 0 : index
    %0 = vector.load %arg1[%c0, %c0_0] : memref<8x32xf32, #tpu.memory_space<vmem>>, vector<8x32xf32>
    %1 = arith.mulf %0, %0 : vector<8x32xf32>
    %cst = arith.constant dense<0.000000e+00> : vector<8xf32>
    %2 = vector.multi_reduction <add>, %1, %cst [1] : vector<8x32xf32> to vector<8xf32>
    %3 = vector.shape_cast %2 : vector<8xf32> to vector<8x1xf32>
    %cst_1 = arith.constant 1.000000e-24 : f32
    %4 = vector.broadcast %cst_1 : f32 to vector<8x1xf32>
    %5 = arith.maximumf %3, %4 : vector<8x1xf32>
    %6 = math.rsqrt %5 : vector<8x1xf32>
    %7 = vector.broadcast %6 : vector<8x1xf32> to vector<8x32xf32>
    %8 = arith.mulf %0, %7 : vector<8x32xf32>
    %9 = arith.truncf %8 : vector<8x32xf32> to vector<8x32xbf16>
    %c0_2 = arith.constant 0 : index
    %c0_3 = arith.constant 0 : index
    %10 = vector.load %arg2[%c0_2, %c0_3] : memref<8x32xbf16, #tpu.memory_space<vmem>>, vector<8x32xbf16>
    tpu.vector_store %arg2[%c0_2, %c0_3], %9 {strides = array<i32>} : memref<8x32xbf16, #tpu.memory_space<vmem>>, vector<8x32xbf16>,
    return
  }
  func.func @transform_0(%arg0: i32) -> (i32, i32) {
    %c0_i32 = arith.constant 0 : i32
    %c0_i32_0 = arith.constant 0 : i32
    return %arg0, %c0_i32 : i32, i32
  }
  func.func @transform_1(%arg0: i32) -> (i32, i32) {
    %c0_i32 = arith.constant 0 : i32
    %c0_i32_0 = arith.constant 0 : i32
    return %arg0, %c0_i32 : i32, i32
  }
}

</mosaic_0001>

<bundles_post_ra>
// kernel: tpu_custom_call.1
= control target key start
LH: loop header
LB: loop body
LE: loop exit
PB: predicated region body
PF: predicated region fallthrough
CT: control target
= control target key end

     0   :  { %6 = vsyncpa [#allocation3], 0  ;;  %s136_s0 = inlined_call_operand.hbm [shape: f32[8,32], index: 0, kind: input, shape index: {}]   ;;  %s137_s1 = inlined_call_operand.hbm [shape: bf16[8,32], index: 1, kind: output, shape index: {}]  }
   0x1   :  { %7 = vsyncpa [#allocation4], 0  ;;  %s100_s6 = smov [#allocation2]   ;;  %s52_s10 = scalar_lea.hbm %s136_s0, 128 }
   0x2   :  { %s14_s7 = sshll.u32 %s100_s6, 4  ;;  %p53_p0 = scmp.ne.s32.totalorder %s136_s0, %s52_s10  ;;  %s15_s7 = int_to_ptr.vmem [resolvable:$true] %s14_s7 }
   0x3   :  { %p56_p1 = scmp.lt.u32.totalorder %s52_s10, %s136_s0 }
   0x5   :  { %p58_p2 = pnand %p56_p1, %p53_p0 }
   0x7   :  { %61 = shalt.err (!%p58_p2)
}
   0x8   :  { %s62_s15 = scalar_lea.vmem %s15_s7, 128  ;;  %p67_p4 = scmp.lt.s32.totalorder %s15_s7, %s15_s7 }
   0x9   :  { %p63_p3 = scmp.ne.s32.totalorder %s15_s7, %s62_s15  ;;  %p68_p5 = scmp.lt.s32.totalorder %s62_s15, %s62_s15 }
   0xb   :  { %p69_p6 = por %p68_p5, %p67_p4 }
   0xd   :  { %p70_p7 = pnand %p69_p6, %p63_p3 }
   0xf   :  { %73 = shalt.err (!%p70_p7)
}
  0x10   :  { %17 = dma.hbm_to_vmem [thread:$0]  %s136_s0, 128, %s15_s7, [#allocation3]  }
  0x11   :  { %96 = dma.done.wait [#allocation3], 128  }
  0x12   :  { %97 = vsyncadd [#allocation3], 4294967168  ;;  %v21_v0 = vld [vmem:[#allocation2] sm:$0xff]  ;;  %vm23_vm0 = vcmask 261120   ;;  %s101_s18 = smov [#allocation5]   ;;  %vm31_vm1 = vcmask 257024  }
  0x13   :  { %v22_v1 = vmul.f32 %v21_v0, %v21_v0  ;;  %s39_s19 = sshll.u32 %s101_s18, 4  ;;  %s40_s19 = int_to_ptr.vmem [resolvable:$true] %s39_s19 }
  0x14   :  { %s74_s20 = scalar_lea.vmem %s40_s19, 64  ;;  %p79_p9 = scmp.lt.s32.totalorder %s40_s19, %s40_s19 }
  0x15   :  { %v24_v2 = vsel %vm23_vm0, %v22_v1, 0.0  ;;  %p75_p8 = scmp.ne.s32.totalorder %s40_s19, %s74_s20  ;;  %p80_p10 = scmp.lt.s32.totalorder %s74_s20, %s74_s20 }
  0x16   :  { %25 = vadd.xlane.f32.xlu0 %v24_v2 }
  0x17   :  { %p81_p11 = por %p80_p10, %p79_p9 }
  0x19   :  { %p82_p12 = pnand %p81_p11, %p75_p8 }
  0xa3   :  { %v26_v3 = vpop.xlane.xlu0 %25 }
  0xa4   :  { %v27_v4 = vmax.f32 %v26_v3, 1e-24 }
  0xa6   :  { %50 = vrsqrt.f32 %v27_v4 }
  0xb0   :  { %v51_v5 = vpop.eup %50 }
  0xb1   :  { %v29_v6 = vmul.f32 %v51_v5, %v21_v0 }
  0xb3   :  { %v30_v7 = vpack.c.bf16 %v29_v6, %v29_v6 }
  0xb5   :  { %32 = vst.msk [vmem:[#allocation5] sm:$0xf] %vm31_vm1, %v30_v7 }
  0xb6   :  { %85 = shalt.err (!%p82_p12)
}
  0xb7   :  { %s86_s22 = scalar_lea.hbm %s137_s1, 64 }
  0xb8   :  { %p87_p13 = scmp.ne.s32.totalorder %s137_s1, %s86_s22  ;;  %p90_p0 = scmp.lt.u32.totalorder %s86_s22, %s137_s1 }
  0xba   :  { %p92_p1 = pnand %p90_p0, %p87_p13 }
  0xbc   :  { %95 = shalt.err (!%p92_p1)
}
  0xbd   :  { %42 = dma.vmem_to_hbm [thread:$0]  %s40_s19, 64, %s137_s1, [#allocation4]  }
  0xbe   :  { %98 = dma.done.wait [#allocation4], 64  }
  0xbf   :  { %99 = vsyncadd [#allocation4], 4294967232 }
  0xc0   :  { %46 = vsyncpa [#allocation3], 1 }
  0xc1   :  { %47 = vsyncpa [#allocation4], 1 }

</bundles_post_ra>
